<compile_context>
chip_gen: v7x
topology: tpu7x:2x2x1
jax: 0.10.0
libtpu: 0.0.40
codegen_flags: <defaults>
</compile_context>

<pallas_src>
import functools

import jax
import jax.numpy as jnp
from jax.experimental import pallas as pl
from jax.experimental.pallas import tpu as pltpu


def _round_up(v, m):
    return (v + m - 1) // m * m


def _vmem_capacity_bytes():
    try:
        info = pltpu.get_tpu_info()
        cap = getattr(info, "vmem_capacity_bytes", None)
        if cap:
            return int(cap)
    except Exception:
        pass
    return 64 * 1024 * 1024  # conservative default (v7x per-TC VMEM)


def prepare_concat_squash_params(wl, bl, wg, bg, wb, *, compute_dtype=None):
    """One-time parameter prep (transpose / pad / cast / concat) -> no per-call weight passes."""
    dim_out, dim_in = wl.shape
    dim_ctx = wg.shape[1]
    cdt = compute_dtype if compute_dtype is not None else wl.dtype

    # Pad dim_out to a lane-dense multiple of 128 only when it is large enough to be worth
    # the trailing output slice; small non-multiples keep full (masked-store) width.
    if dim_out % 128 == 0 or dim_out <= 512:
        dim_out_p = dim_out
    else:
        dim_out_p = _round_up(dim_out, 128)
    pad_o = dim_out_p - dim_out

    wl_t = jnp.pad(wl.T.astype(cdt), ((0, 0), (0, pad_o)))            # (dim_in, dim_out_p)
    bl_p = jnp.pad(bl.astype(jnp.float32), (0, pad_o))                # (dim_out_p,)
    bg_p = jnp.pad(bg.astype(jnp.float32), (0, pad_o))                # (dim_out_p,)
    wg_t = jnp.pad(wg.T.astype(jnp.float32), ((0, 0), (0, pad_o)))
    wb_t = jnp.pad(wb.T.astype(jnp.float32), ((0, 0), (0, pad_o)))
    wgb = jnp.concatenate([wg_t, wb_t], axis=1)                       # (dim_ctx, 2*dim_out_p)

    return dict(wl_t=wl_t, bl=bl_p, bg=bg_p, wgb=wgb,
                dim_in=dim_in, dim_out=dim_out, dim_out_p=dim_out_p,
                dim_ctx=dim_ctx, compute_dtype=cdt)


def _concat_squash_kernel(gc_ref, x_ref, wl_ref, o_ref, *, compute_dtype):
    # gc_ref: (1, 2, tdo) f32   row 0 = sigmoid gate, row 1 = gate*bl + hyper_bias
    # x_ref : (1, tn, dim_in)   HBM dtype; cast to compute dtype in-kernel (free VPU slot)
    # wl_ref: (dim_in, tdo)     compute dtype; grid-invariant along the N axis
    # o_ref : (1, tn, tdo)
    xt = x_ref[0]
    if xt.dtype != compute_dtype:
        xt = xt.astype(compute_dtype)
    h = jnp.dot(xt, wl_ref[...], preferred_element_type=jnp.float32)   # (tn, tdo) f32
    gc = gc_ref[0]                                                     # (2, tdo) f32
    o_ref[0] = (h * gc[0:1, :] + gc[1:2, :]).astype(o_ref.dtype)


def concat_squash_linear(ctx, x, params, *, tile_n=None, single_buffer_weight=True):
    """ConcatSquashLinear forward.  ctx: (B, 1, dim_ctx), x: (B, N, dim_in)."""
    B, N, dim_in = x.shape
    assert dim_in == params["dim_in"]
    dim_out = params["dim_out"]
    dim_out_p = params["dim_out_p"]
    dim_ctx = params["dim_ctx"]
    cdt = params["compute_dtype"]
    out_dtype = x.dtype

    # ---- hoisted hyper-network: one tiny batched f32 matmul, layer bias folded in ----
    ctx2d = ctx.reshape(B, dim_ctx).astype(jnp.float32)
    gb = jnp.dot(ctx2d, params["wgb"], preferred_element_type=jnp.float32)   # (B, 2*dim_out_p)
    gate = jax.nn.sigmoid(gb[:, :dim_out_p] + params["bg"])
    cbias = gate * params["bl"] + gb[:, dim_out_p:]
    gc = jnp.stack([gate, cbias], axis=1)                                    # (B, 2, dim_out_p)

    # ---- per-generation VMEM budget & compiler limit ----
    vmem_cap = _vmem_capacity_bytes()
    budget = int(vmem_cap * 0.70)      # tile-sizing budget (~45 MiB v7x, ~90 MiB v5e/v6e)
    vmem_limit = int(vmem_cap * 0.85)  # scoped limit handed to the compiler

    x_item = jnp.dtype(x.dtype).itemsize
    w_item = jnp.dtype(cdt).itemsize
    o_item = jnp.dtype(out_dtype).itemsize
    sub = 8 if x_item >= 4 else (16 if x_item == 2 else 32)

    # ---- dim_out (column) tiling: bound the weight block independently of dim_out ----
    if dim_out_p % 128 != 0:
        tdo = dim_out_p                      # small, unpadded -> full width
    else:
        cands = [c for c in (dim_out_p, 1024, 512, 256, 128)
                 if c <= dim_out_p and dim_out_p % c == 0]
        tdo = cands[-1]
        for c in cands:
            if dim_in * c * w_item <= budget // 3:
                tdo = c
                break
    n_do = dim_out_p // tdo

    # ---- N tile from the VMEM budget (single-buffered weight, f32 h tile counted) ----
    w_bufs = 1 if single_buffer_weight else 2
    fixed = (w_bufs * dim_in * tdo * w_item        # weight column block
             + 2 * 2 * tdo * 4                     # fused gate/bias block (double-buffered)
             + (1 << 20))                          # slack for internal scratch
    per_row = (2 * dim_in * x_item                 # x tile (double-buffered)
               + 2 * tdo * o_item                  # output tile (double-buffered)
               + 2 * tdo * 4)                      # f32 h tile + elementwise temporaries
    if tile_n is None:
        tn_max = max(sub, (budget - fixed) // per_row)
        tn_max = min(2048, tn_max)
    else:
        tn_max = tile_n
    tn_max = max(sub, (tn_max // sub) * sub)

    # Prefer an N tile that divides N exactly (no pad pass, no trailing output slice).
    pad_n = False
    if N <= tn_max:
        tn = N
    elif N % sub == 0:
        tn = sub
        for c in range(tn_max, sub - 1, -sub):
            if N % c == 0:
                tn = c
                break
        if tn < max(sub, tn_max // 8):   # divisor too small: padding beats tiny grid steps
            tn, pad_n = tn_max, True
    else:
        tn, pad_n = tn_max, True

    n_p = _round_up(N, tn) if pad_n else N
    x_in = jnp.pad(x, ((0, 0), (0, n_p - N), (0, 0))) if pad_n else x
    n_n = n_p // tn

    # v7x has two TensorCores: make sure at least one parallel axis has >= 2 steps.
    if (not pad_n) and B * n_do * n_n == 1 and N >= 2 * sub and N % (2 * sub) == 0:
        tn = N // 2
        n_n = 2

    grid = (B, n_do, n_n)

    cost = pl.CostEstimate(
        flops=2 * B * n_p * dim_in * dim_out_p,
        transcendentals=0,
        bytes_accessed=(B * n_p * dim_in * x_item * n_do
                        + B * dim_in * dim_out_p * w_item
                        + B * 2 * dim_out_p * 4
                        + B * n_p * dim_out_p * o_item),
    )

    kernel = functools.partial(_concat_squash_kernel, compute_dtype=cdt)

    def _call(use_single_buffer):
        wl_kwargs = dict(pipeline_mode=pl.Buffered(1)) if use_single_buffer else {}
        return pl.pallas_call(
            kernel,
            out_shape=jax.ShapeDtypeStruct((B, n_p, dim_out_p), out_dtype),
            grid_spec=pltpu.PrefetchScalarGridSpec(
                num_scalar_prefetch=0,
                grid=grid,
                in_specs=[
                    pl.BlockSpec((1, 2, tdo), lambda b, j, n: (b, 0, j)),      # gate + folded bias
                    pl.BlockSpec((1, tn, dim_in), lambda b, j, n: (b, n, 0)),  # x tile
                    pl.BlockSpec((dim_in, tdo), lambda b, j, n: (0, j),        # Wl^T column block
                                 **wl_kwargs),
                ],
                out_specs=pl.BlockSpec((1, tn, tdo), lambda b, j, n: (b, n, j)),
            ),
            compiler_params=pltpu.CompilerParams(
                dimension_semantics=("parallel", "parallel", "parallel"),
                vmem_limit_bytes=vmem_limit,
            ),
            cost_estimate=cost,
        )(gc, x_in, params["wl_t"])

    try:
        out = _call(single_buffer_weight)
    except Exception:
        # pl.Buffered(1) not supported on this jax version -> default double buffering.
        out = _call(False)

    if pad_n or dim_out_p != dim_out:
        out = out[:, :N, :dim_out]
    return out


def _reference(ctx, x, wl, bl, wg, bg, wb):
    gate = jax.nn.sigmoid(jnp.einsum("bsc,oc->bso", ctx, wg) + bg)
    bias = jnp.einsum("bsc,oc->bso", ctx, wb)
    ret = (jnp.einsum("bni,oi->bno", x, wl) + bl) * gate + bias
    return ret


if __name__ == "__main__":
    key = jax.random.PRNGKey(0)
    B, N = 2, 8
    dim_in, dim_out, dim_ctx = 32, 32, 8

    keys = jax.random.split(key, 8)
    ctx = jax.random.normal(keys[0], (B, 1, dim_ctx), dtype=jnp.float32)
    x = jax.random.normal(keys[1], (B, N, dim_in), dtype=jnp.float32)

    # Deterministic parameters (PyTorch Linear-shaped weights).
    wl = jax.random.normal(keys[2], (dim_out, dim_in), dtype=jnp.float32) * 0.1
    bl = jax.random.normal(keys[3], (dim_out,), dtype=jnp.float32) * 0.1
    wg = jax.random.normal(keys[4], (dim_out, dim_ctx), dtype=jnp.float32) * 0.1
    bg = jax.random.normal(keys[5], (dim_out,), dtype=jnp.float32) * 0.1
    wb = jax.random.normal(keys[6], (dim_out, dim_ctx), dtype=jnp.float32) * 0.1

    ref = _reference(ctx, x, wl, bl, wg, bg, wb)

    # f32 path (matches reference tightly)
    params_f32 = prepare_concat_squash_params(wl, bl, wg, bg, wb)
    out = concat_squash_linear(ctx, x, params_f32)
    out = jax.block_until_ready(out)
    assert out.shape == (B, N, dim_out)
    assert jnp.allclose(out, ref, atol=1e-5, rtol=1e-5), "f32 kernel mismatch vs reference"

    # bf16 fast path (MXU-friendly weight dtype, in-kernel x cast, f32 accumulation)
    params_bf16 = prepare_concat_squash_params(wl, bl, wg, bg, wb, compute_dtype=jnp.bfloat16)
    out_bf16 = concat_squash_linear(ctx, x, params_bf16)
    out_bf16 = jax.block_until_ready(out_bf16)
    assert out_bf16.shape == (B, N, dim_out)
    assert jnp.allclose(out_bf16, ref, atol=5e-2, rtol=5e-2), "bf16 kernel mismatch vs reference"

    print("KERNEL_OK")
</pallas_src>

<mosaic_0001>
module attributes {stable_mosaic.version = 11 : i64} {
  func.func @_concat_squash_kernel(%arg0: i32, %arg1: i32, %arg2: i32, %arg3: memref<1x2x32xf32, #tpu.memory_space<vmem>>, %arg4: memref<1x8x32xf32, #tpu.memory_space<vmem>>, %arg5: memref<32x32xf32, #tpu.memory_space<vmem>>, %arg6: memref<1x8x32xf32, #tpu.memory_space<vmem>>) attributes {dimension_semantics = [#tpu.dimension_semantics<parallel>, #tpu.dimension_semantics<parallel>, #tpu.dimension_semantics<parallel>], iteration_bounds = array<i64: 2, 1, 1>, scalar_prefetch = 0 : i64, scratch_operands = 0 : i64, tpu.core_type = #tpu.core_type<tc>, window_params = [{transform_indices = @transform_0, window_bounds = array<i64: 1, 2, 32>}, {transform_indices = @transform_1, window_bounds = array<i64: 1, 8, 32>}, {pipeline_mode = #tpu.pipeline_mode<synchronous>, transform_indices = @transform_2, window_bounds = array<i64: 32, 32>}, {transform_indices = @transform_3, window_bounds = array<i64: 1, 8, 32>}]} {
    %c0 = arith.constant 0 : index
    %c0_0 = arith.constant 0 : index
    %c0_1 = arith.constant 0 : index
    %0 = vector.load %arg4[%c0, %c0_0, %c0_1] : memref<1x8x32xf32, #tpu.memory_space<vmem>>, vector<1x8x32xf32>
    %1 = vector.shape_cast %0 : vector<1x8x32xf32> to vector<8x32xf32>
    %c0_2 = arith.constant 0 : index
    %c0_3 = arith.constant 0 : index
    %2 = vector.load %arg5[%c0_2, %c0_3] : memref<32x32xf32, #tpu.memory_space<vmem>>, vector<32x32xf32>
    %cst = arith.constant dense<0.000000e+00> : vector<8x32xf32>
    %3 = tpu.matmul %1, %2, %cst {dimension_numbers = #tpu.dot_dimension_numbers<[1], [0], [0], [1], [0, 0, 1, 1], [], []>} : vector<8x32xf32>, vector<32x32xf32>, vector<8x32xf32> -> vector<8x32xf32>
    %c0_4 = arith.constant 0 : index
    %c0_5 = arith.constant 0 : index
    %c0_6 = arith.constant 0 : index
    %4 = vector.load %arg3[%c0_4, %c0_5, %c0_6] : memref<1x2x32xf32, #tpu.memory_space<vmem>>, vector<1x2x32xf32>
    %5 = vector.shape_cast %4 : vector<1x2x32xf32> to vector<2x32xf32>
    %6 = vector.extract_strided_slice %5 {offsets = [0, 0], sizes = [1, 32], strides = [1, 1]} : vector<2x32xf32> to vector<1x32xf32>
    %7 = vector.broadcast %6 : vector<1x32xf32> to vector<8x32xf32>
    %8 = arith.mulf %3, %7 : vector<8x32xf32>
    %9 = vector.extract_strided_slice %5 {offsets = [1, 0], sizes = [1, 32], strides = [1, 1]} : vector<2x32xf32> to vector<1x32xf32>
    %10 = vector.broadcast %9 : vector<1x32xf32> to vector<8x32xf32>
    %11 = arith.addf %8, %10 : vector<8x32xf32>
    %c0_7 = arith.constant 0 : index
    %c0_8 = arith.constant 0 : index
    %c0_9 = arith.constant 0 : index
    %12 = vector.load %arg6[%c0_7, %c0_8, %c0_9] : memref<1x8x32xf32, #tpu.memory_space<vmem>>, vector<1x8x32xf32>
    %13 = vector.shape_cast %12 : vector<1x8x32xf32> to vector<8x32xf32>
    %14 = vector.shape_cast %11 : vector<8x32xf32> to vector<1x8x32xf32>
    tpu.vector_store %arg6[%c0_7, %c0_8, %c0_9], %14 {strides = array<i32>} : memref<1x8x32xf32, #tpu.memory_space<vmem>>, vector<1x8x32xf32>,
    return
  }
  func.func @transform_0(%arg0: i32, %arg1: i32, %arg2: i32) -> (i32, i32, i32) {
    %c0_i32 = arith.constant 0 : i32
    %c0_i32_0 = arith.constant 0 : i32
    return %arg0, %c0_i32, %arg1 : i32, i32, i32
  }
  func.func @transform_1(%arg0: i32, %arg1: i32, %arg2: i32) -> (i32, i32, i32) {
    %c0_i32 = arith.constant 0 : i32
    %c0_i32_0 = arith.constant 0 : i32
    return %arg0, %arg2, %c0_i32 : i32, i32, i32
  }
  func.func @transform_2(%arg0: i32, %arg1: i32, %arg2: i32) -> (i32, i32) {
    %c0_i32 = arith.constant 0 : i32
    %c0_i32_0 = arith.constant 0 : i32
    return %c0_i32, %arg1 : i32, i32
  }
  func.func @transform_3(%arg0: i32, %arg1: i32, %arg2: i32) -> (i32, i32, i32) {
    %c0_i32 = arith.constant 0 : i32
    return %arg0, %arg2, %arg1 : i32, i32, i32
  }
}

module attributes {stable_mosaic.version = 11 : i64} {
  func.func @_concat_squash_kernel(%arg0: i32, %arg1: i32, %arg2: i32, %arg3: memref<1x2x32xf32, #tpu.memory_space<vmem>>, %arg4: memref<1x8x32xf32, #tpu.memory_space<vmem>>, %arg5: memref<32x32xf32, #tpu.memory_space<vmem>>, %arg6: memref<1x8x32xf32, #tpu.memory_space<vmem>>) attributes {dimension_semantics = [#tpu.dimension_semantics<parallel>, #tpu.dimension_semantics<parallel>, #tpu.dimension_semantics<parallel>], iteration_bounds = array<i64: 2, 1, 1>, scalar_prefetch = 0 : i64, scratch_operands = 0 : i64, tpu.core_type = #tpu.core_type<tc>, window_params = [{transform_indices = @transform_0, window_bounds = array<i64: 1, 2, 32>}, {transform_indices = @transform_1, window_bounds = array<i64: 1, 8, 32>}, {transform_indices = @transform_2, window_bounds = array<i64: 32, 32>}, {transform_indices = @transform_3, window_bounds = array<i64: 1, 8, 32>}]} {
    %c0 = arith.constant 0 : index
    %c0_0 = arith.constant 0 : index
    %c0_1 = arith.constant 0 : index
    %0 = vector.load %arg4[%c0, %c0_0, %c0_1] : memref<1x8x32xf32, #tpu.memory_space<vmem>>, vector<1x8x32xf32>
    %1 = vector.shape_cast %0 : vector<1x8x32xf32> to vector<8x32xf32>
    %c0_2 = arith.constant 0 : index
    %c0_3 = arith.constant 0 : index
    %2 = vector.load %arg5[%c0_2, %c0_3] : memref<32x32xf32, #tpu.memory_space<vmem>>, vector<32x32xf32>
    %cst = arith.constant dense<0.000000e+00> : vector<8x32xf32>
    %3 = tpu.matmul %1, %2, %cst {dimension_numbers = #tpu.dot_dimension_numbers<[1], [0], [0], [1], [0, 0, 1, 1], [], []>} : vector<8x32xf32>, vector<32x32xf32>, vector<8x32xf32> -> vector<8x32xf32>
    %c0_4 = arith.constant 0 : index
    %c0_5 = arith.constant 0 : index
    %c0_6 = arith.constant 0 : index
    %4 = vector.load %arg3[%c0_4, %c0_5, %c0_6] : memref<1x2x32xf32, #tpu.memory_space<vmem>>, vector<1x2x32xf32>
    %5 = vector.shape_cast %4 : vector<1x2x32xf32> to vector<2x32xf32>
    %6 = vector.extract_strided_slice %5 {offsets = [0, 0], sizes = [1, 32], strides = [1, 1]} : vector<2x32xf32> to vector<1x32xf32>
    %7 = vector.broadcast %6 : vector<1x32xf32> to vector<8x32xf32>
    %8 = arith.mulf %3, %7 : vector<8x32xf32>
    %9 = vector.extract_strided_slice %5 {offsets = [1, 0], sizes = [1, 32], strides = [1, 1]} : vector<2x32xf32> to vector<1x32xf32>
    %10 = vector.broadcast %9 : vector<1x32xf32> to vector<8x32xf32>
    %11 = arith.addf %8, %10 : vector<8x32xf32>
    %c0_7 = arith.constant 0 : index
    %c0_8 = arith.constant 0 : index
    %c0_9 = arith.constant 0 : index
    %12 = vector.load %arg6[%c0_7, %c0_8, %c0_9] : memref<1x8x32xf32, #tpu.memory_space<vmem>>, vector<1x8x32xf32>
    %13 = vector.shape_cast %12 : vector<1x8x32xf32> to vector<8x32xf32>
    %14 = vector.shape_cast %11 : vector<8x32xf32> to vector<1x8x32xf32>
    tpu.vector_store %arg6[%c0_7, %c0_8, %c0_9], %14 {strides = array<i32>} : memref<1x8x32xf32, #tpu.memory_space<vmem>>, vector<1x8x32xf32>,
    return
  }
  func.func @transform_0(%arg0: i32, %arg1: i32, %arg2: i32) -> (i32, i32, i32) {
    %c0_i32 = arith.constant 0 : i32
    %c0_i32_0 = arith.constant 0 : i32
    return %arg0, %c0_i32, %arg1 : i32, i32, i32
  }
  func.func @transform_1(%arg0: i32, %arg1: i32, %arg2: i32) -> (i32, i32, i32) {
    %c0_i32 = arith.constant 0 : i32
    %c0_i32_0 = arith.constant 0 : i32
    return %arg0, %arg2, %c0_i32 : i32, i32, i32
  }
  func.func @transform_2(%arg0: i32, %arg1: i32, %arg2: i32) -> (i32, i32) {
    %c0_i32 = arith.constant 0 : i32
    %c0_i32_0 = arith.constant 0 : i32
    return %c0_i32, %arg1 : i32, i32
  }
  func.func @transform_3(%arg0: i32, %arg1: i32, %arg2: i32) -> (i32, i32, i32) {
    %c0_i32 = arith.constant 0 : i32
    return %arg0, %arg2, %arg1 : i32, i32, i32
  }
}

</mosaic_0001>

<bundles_post_ra>
// kernel: tpu_custom_call.1
= control target key start
LH: loop header
LB: loop body
LE: loop exit
PB: predicated region body
PF: predicated region fallthrough
CT: control target
= control target key end

     0   :  { %s1092_s0 = inlined_call_operand.hbm [shape: f32[2,2,32], index: 0, kind: input, shape index: {}]   ;;  %s1093_s1 = inlined_call_operand.hbm [shape: f32[2,8,32], index: 1, kind: input, shape index: {}]   ;;  %s1094_s2 = inlined_call_operand.hbm [shape: f32[32,32], index: 2, kind: input, shape index: {}]   ;;  %s1095_s3 = inlined_call_operand.hbm [shape: f32[2,8,32], index: 3, kind: output, shape index: {}]  }
   0x1   :  { %1100 = sst [smem:[#allocation13_spill]] %s1092_s0 }
   0x2   :  { %8 = vsyncpa [#allocation3], 0 }
   0x3   :  { %10 = vsyncpa [#allocation3 + $0x1], 0 }
   0x4   :  { %11 = vsyncpa [#allocation6], 0 }
   0x5   :  { %13 = vsyncpa [#allocation6 + $0x1], 0 }
   0x6   :  { %14 = vsyncpa [#allocation4], 0 }
   0x7   :  { %16 = vsyncpa [#allocation4 + $0x1], 0  ;;  %s832_s12 = smov 0   ;;  %s834_s13 = smov 0  }
   0x8   :  { %s836_s14 = smov 0   ;;  %s838_s15 = smov 0  }
   0x9   :  { %s840_s16 = smov 0   ;;  %s842_s17 = smov 0  }
   0xa LB: > { %s863_s18 = sadd.s32 4294967295, %s801_s17   ;;  %s500_s19 = sadd.s32 4294967294, %s801_s17   ;;  %s801_s17 = sphi %s842_s17, %s22_s17   ;;  %s797_s16 = sphi %s840_s16, %s1121_s16   ;;  %s793_s15 = sphi %s838_s15, %s1120_s15   ;;  %s789_s14 = sphi %s836_s14, %s1119_s14   ;;  %s785_s13 = sphi %s834_s13, %s1118_s13   ;;  %s781_s12 = sphi %s832_s12, %s1117_s12  }
   0xb   : > { %p63_p0 = scmp.ne.s32.totalorder %s785_s13, %s781_s12  ;;  %p1096_p1 = scmp.eq.s32.totalorder %s863_s18, 0 }
   0xc   : > { %p151_p3 = scmp.eq.s32.totalorder %s500_s19, 1  ;;  %p501_p5 = scmp.ge.s32.totalorder %s801_s17, 1 }
   0xd   : > { %p872_p4 = por %p1096_p1, %p63_p0  ;;  %p158_p7 = scmp.lt.s32.totalorder %s801_s17, 3 }
   0xe   : > { %p877_p6 = por %p151_p3, %p63_p0  ;;  %s803_s23 = smov [#allocation7]  }
   0xf   : > { %s1101_s20 = scalar_select %p872_p4, 1, 0 }
  0x10   : > { %s1102_s21 = scalar_select %p877_p6, 1, 0 }
  0x11   : > { %p882_p8 = pnand %p501_p5, %p158_p7  ;;  %s172_s24 = sshll.u32 %s803_s23, 4  ;;  %s173_s24 = int_to_ptr.vmem [resolvable:$true] %s172_s24 }
  0x12   : > { %s41_s26 = sadd.s32 1, %s797_s16  ;;  %s623_s29 = scalar_lea.hbm %s1094_s2, 512 }
  0x13   : > { %s1103_s22 = scalar_select %p882_p8, 1, 0 }
  0x14   : > { %p550_p9 = pneg %p882_p8  ;;  %p624_p12 = scmp.ne.s32.totalorder %s1094_s2, %s623_s29 }
  0x15   : > { %p630_p5 = scmp.lt.u32.totalorder %s623_s29, %s1094_s2 }
  0x16   : > { %p891_p11 = pnand %p550_p9, %p1096_p1 }
  0x18   : > { %p625_p13 = pneg %p891_p11 }
  0x1a   : > { %p626_p0 = pnand %p625_p13, %p624_p12 }
  0x1c   : > { %p627_p3 = pneg %p626_p0 }
  0x1e   : > { %p632_p7 = pnand %p630_p5, %p627_p3 }
  0x20   : > { %635 = shalt.err (!%p632_p7)
}
  0x21   : > { %s636_s7 = scalar_lea.vmem %s173_s24, 512  ;;  %p644_p2 = scmp.lt.s32.totalorder %s173_s24, %s173_s24 }
  0x22   : > { %p637_p9 = scmp.ne.s32.totalorder %s173_s24, %s636_s7  ;;  %p645_p6 = scmp.lt.s32.totalorder %s636_s7, %s636_s7 }
  0x24   : > { %p639_p10 = pnand %p637_p9, %p625_p13  ;;  %p646_p4 = por %p645_p6, %p644_p2 }
  0x26   : > { %p640_p1 = pneg %p639_p10 }
  0x28   : > { %p647_p8 = pnand %p646_p4, %p640_p1 }
  0x2a   : > { %650 = shalt.err (!%p647_p8)
}
  0x2b   : > { %s804_s8 = smov 128   ;;  %s805_s9 = smov 8  }
  0x2c   : > { %553 = dma.hbm_to_vmem [thread:$0]  (!%p891_p11), %s1094_s2, 512, %s173_s24, [#allocation6], %s804_s8, %s804_s8, %s805_s9  }
  0x2d   : > { %p43_p1 = scmp.ge.s32.totalorder %s41_s26, 2  ;;  %s50_s19 = sadd.s32 1, %s789_s14 }
  0x2e   : > { %p57_p2 = scmp.ne.s32.totalorder %s789_s14, %s785_s13  ;;  %p58_p4 = scmp.eq.s32.totalorder %s801_s17, 0 }
  0x2f   : > { %s1123_s26 = smov (%p43_p1, %s41_s26), 0  ;;  %p1106_p8 = scmp.eq.s32.totalorder %s863_s18, 1 }
  0x30   : > { %p918_p6 = por %p58_p4, %p57_p2  ;;  %s45_s27 = ssub.s32 %s797_s16, %s1123_s26 }
  0x31   : > { %p924_p10 = por %p1106_p8, %p57_p2  ;;  %p566_p11 = scmp.lt.s32.totalorder %s801_s17, 2 }
  0x32   : > { %p48_p12 = scmp.eq.s32.totalorder %s45_s27, 0  ;;  %s932_s24 = sand.u32 1, %s789_s14  }
  0x33   : > { %s1107_s25 = scalar_select %p924_p10, 1, 0 }
  0x34   : > { %s504_s28 = sshll.u32 %s932_s24, 1  ;;  %s505_s30 = sshll.u32 %s797_s16, 5 }
  0x35   : > { %s936_s29 = scalar_select %p48_p12, %s789_s14, %s50_s19  }
  0x36   : > { %s1108_s0 = sld [smem:[#allocation13_spill]]  ;;  %s190_s7 = scalar_lea.vmem [#allocation2], %s504_s28 }
  0x37   : > { %s198_s8 = sshll.u32 %s190_s7, 4  ;;  %p948_p13 = pnand %p566_p11, %p918_p6  ;;  %s944_s8 = int_to_ptr.vmem [resolvable:$true] %s198_s8 }
  0x38   : > { %s205_s10 = sand.u32 1, %s801_s17   ;;  %s506_s11 = sshll.u32 %s932_s24, 3 }
  0x39   : > { %s187_s19 = scalar_lea.sflag [#allocation3], %s932_s24  ;;  %p653_p3 = pneg %p948_p13 }
  0x3c   : > { %s942_s6 = scalar_lea.hbm %s1108_s0, %s505_s30  ;;  %s656_s23 = scalar_lea.hbm %s1108_s0, 64 }
  0x3d   : > { %s651_s27 = scalar_lea.hbm %s942_s6, 32  ;;  %p657_p9 = scmp.lt.u32.totalorder %s942_s6, %s1108_s0 }
  0x3e   : > { %p652_p0 = scmp.ne.s32.totalorder %s942_s6, %s651_s27  ;;  %p658_p1 = scmp.lt.u32.totalorder %s656_s23, %s651_s27 }
  0x3f   : > { %p660_p4 = scmp.lt.u32.totalorder %s651_s27, %s942_s6 }
  0x40   : > { %p654_p5 = pnand %p653_p3, %p652_p0  ;;  %p659_p2 = por %p658_p1, %p657_p9 }
  0x42   : > { %p655_p7 = pneg %p654_p5  ;;  %p661_p6 = por %p660_p4, %p659_p2 }
  0x44   : > { %p662_p8 = pnand %p661_p6, %p655_p7 }
  0x46   : > { %665 = shalt.err (!%p662_p8)
}
  0x47   : > { %s666_s7 = scalar_lea.vmem %s944_s8, 32  ;;  %s806_s28 = smov [#allocation2]  }
  0x48   : > { %p667_p11 = scmp.ne.s32.totalorder %s944_s8, %s666_s7  ;;  %s671_s30 = sshll.u32 %s806_s28, 4  ;;  %s672_s30 = int_to_ptr.vmem [resolvable:$false] %s671_s30 }
  0x49   : > { %s673_s4 = scalar_lea.vmem %s672_s30, 64  ;;  %p674_p5 = scmp.lt.s32.totalorder %s944_s8, %s672_s30 }
  0x4a   : > { %p669_p12 = pnand %p667_p11, %p653_p3  ;;  %p675_p9 = scmp.lt.s32.totalorder %s673_s4, %s666_s7 }
  0x4c   : > { %p670_p0 = pneg %p669_p12  ;;  %p676_p1 = por %p675_p9, %p674_p5 }
  0x4e   : > { %p677_p2 = pnand %p676_p1, %p670_p0 }
  0x50   : > { %680 = shalt.err (!%p677_p2)
}
  0x51   : > { %557 = dma.hbm_to_vmem [thread:$0]  (!%p948_p13), %s942_s6, 32, %s944_s8, %s187_s19  }
  0x52   : > { %s507_s27 = sshll.u32 %s797_s16, 7  ;;  %s209_s7 = scalar_lea.vmem [#allocation5], %s506_s11 }
  0x53   : > { %s984_s28 = scalar_lea.hbm %s1093_s1, %s507_s27  ;;  %s217_s30 = sshll.u32 %s209_s7, 4  ;;  %s218_s30 = int_to_ptr.vmem [resolvable:$true] %s217_s30 }
  0x54   : > { %s206_s4 = scalar_lea.sflag [#allocation6], %s205_s10  ;;  %s681_s0 = scalar_lea.hbm %s984_s28, 128 }
  0x55   : > { %p682_p7 = scmp.ne.s32.totalorder %s984_s28, %s681_s0  ;;  %s686_s19 = scalar_lea.hbm %s1093_s1, 256 }
  0x56   : > { %p687_p8 = scmp.lt.u32.totalorder %s984_s28, %s1093_s1  ;;  %p688_p11 = scmp.lt.u32.totalorder %s686_s19, %s681_s0 }
  0x57   : > { %p684_p4 = pnand %p682_p7, %p653_p3  ;;  %p690_p0 = scmp.lt.u32.totalorder %s681_s0, %s984_s28 }
  0x58   : > { %p689_p12 = por %p688_p11, %p687_p8 }
  0x59   : > { %p685_p6 = pneg %p684_p4 }
  0x5a   : > { %p691_p5 = por %p690_p0, %p689_p12 }
  0x5c   : > { %p692_p9 = pnand %p691_p5, %p685_p6 }
  0x5e   : > { %695 = shalt.err (!%p692_p9)
}
  0x5f   : > { %s696_s10 = scalar_lea.vmem %s218_s30, 128  ;;  %s807_s11 = smov [#allocation5]  }
  0x60   : > { %p697_p1 = scmp.ne.s32.totalorder %s218_s30, %s696_s10  ;;  %s701_s23 = sshll.u32 %s807_s11, 4  ;;  %s702_s23 = int_to_ptr.vmem [resolvable:$false] %s701_s23 }
  0x61   : > { %s703_s5 = scalar_lea.vmem %s702_s23, 256  ;;  %p704_p4 = scmp.lt.s32.totalorder %s218_s30, %s702_s23 }
  0x62   : > { %p699_p2 = pnand %p697_p1, %p653_p3  ;;  %p705_p10 = scmp.lt.s32.totalorder %s703_s5, %s696_s10 }
  0x64   : > { %p700_p7 = pneg %p699_p2  ;;  %p706_p8 = por %p705_p10, %p704_p4 }
  0x66   : > { %p707_p11 = pnand %p706_p8, %p700_p7 }
  0x68   : > { %710 = shalt.err (!%p707_p11)
}
  0x69   : > { %560 = dma.hbm_to_vmem [thread:$0]  (!%p948_p13), %s984_s28, 128, %s218_s30, %s206_s4  }
  0x6a   : > { %p1110_p6 = scmp.ne.s32.totalorder %s1103_s22, 0 }
  0x6b   : > { %s1012_s0 = sand.u32 (!%p1110_p6), 1, %s785_s13   ;;  %p1111_p10 = scmp.ne.s32.totalorder (!%p1110_p6), %s1101_s20, 0 }
  0x6c   : > { %226 = sbr.rel (%p1110_p6) target bundleno = 362 (0x16a), region = 32  ;;  %s509_s7 = sshll.u32 (!%p1110_p6), %s1012_s0, 1 }
  0x6d   : > { %s229_s6 = scalar_lea.sflag (!%p1110_p6), [#allocation3], %s1012_s0  ;;  %s1016_s8 = scalar_lea.vmem (!%p1110_p6), [#allocation2], %s509_s7 }
  0x73   : > { %764 = dma.done.wait (%p1111_p10), %s229_s6, 32  }
  0x74   : > { %766 = vsyncadd (%p1111_p10), %s229_s6, 4294967264  ;;  %s237_s22 = sand.u32 1, %s863_s18   ;;  %s510_s9 = sshll.u32 %s1012_s0, 3 }
  0x75   : > { %s238_s28 = scalar_lea.sflag [#allocation6], %s237_s22  ;;  %s241_s30 = scalar_lea.vmem [#allocation5], %s510_s9 }
  0x76   : > { %768 = dma.done.wait (%p1111_p10), %s238_s28, 128  }
  0x77   : > { %770 = vsyncadd (%p1111_p10), %s238_s28, 4294967168  ;;  %p1112_p13 = scmp.eq.s32.totalorder %s863_s18, 0 }
  0x79   : > { %772 = dma.done.wait (%p1112_p13), [#allocation6], 512   ;;  %p1113_p3 = pmov %p1112_p13 }
  0x7a   : > { %v808_v0 = vmov 0.0|0.0   ;;  %vm809_vm0 = vmmov 0   ;;  %v810_v1 = vmov 0.0   ;;  %v274_v2 = vld [vmem:[#allocation7] sm:$0xff]  ;;  %v275_v3 = vld [vmem:[#allocation7 + $0x8] sm:$0xff]  ;;  %v276_v4 = vld [vmem:[#allocation7 + $0x10] sm:$0xff]  ;;  %v353_v9 = vlaneseq }
  0x7b   : > { %774 = vsyncadd (%p1113_p3), [#allocation6], 4294966784  ;;  %534 = vmatprep.subr.bf16.mxu0 %v808_v0  ;;  %531 = vmatprep.mubr.msk.f32.mxu0 %vm809_vm0, %v810_v1  ;;  %v535_v5 = vpack.c.bf16 %v275_v3, %v274_v2  ;;  %v277_v6 = vld [vmem:[#allocation7 + $0x18] sm:$0xff]  ;;  %vm278_vm1 = vcmask 261120   ;;  %v352_v12 = vld [vmem:[%s1016_s8] sm:$0x3] }
  0x7c   : > { %v538_v7 = vpack.c.bf16 %v277_v6, %v276_v4  ;;  %v273_v8 = vld [vmem:[%s241_s30] sm:$0xff]  ;;  %v354_v10 = vshrl.u32 %v353_v9, 7  ;;  %s515_s18 = sshll.u32 %s793_s15, 7  ;;  %s272_s20 = scalar_lea.vmem [#allocation8], %s510_s9 }
  0x7d   : > { %536 = vmatpush3.bf16.msra.mxu0 %v535_v5  ;;  %s380_s4 = sshll.u32 %s272_s20, 4  ;;  %s1042_s27 = scalar_lea.hbm %s1095_s3, %s515_s18  ;;  %s1044_s4 = int_to_ptr.vmem [resolvable:$true] %s380_s4 }
  0x7e   : > { %537 = vmatprep.subr.bf16.mxu0 %v808_v0  ;;  %v355_v11 = vsub.s32 0, %v354_v10  ;;  %v360_v13 = vsub.s32 1, %v354_v10  ;;  %s365_s10 = scalar_lea.sflag [#allocation4], %s1012_s0  ;;  %s711_s15 = scalar_lea.vmem %s1044_s4, 128 }
  0x7f   : > { %p712_p12 = scmp.ne.s32.totalorder %s1044_s4, %s711_s15  ;;  %p1114_p0 = scmp.ne.s32.totalorder %s1107_s25, 0 }
  0x80   : > { %v356_v14 = vrot.slane %v352_v12, %v355_v11  ;;  %v361_v15 = vrot.slane %v352_v12, %v360_v13  ;;  %s811_s11 = smov [#allocation8]  }
  0x81   : > { %539 = vmatpush3.bf16.msra.mxu0 %v538_v7  ;;  %p713_p5 = pnand %p712_p12, %p1114_p0  ;;  %s715_s23 = sshll.u32 %s811_s11, 4  ;;  %s716_s23 = int_to_ptr.vmem [resolvable:$false] %s715_s23 }
  0x82   : > { %s717_s5 = scalar_lea.vmem %s716_s23, 256  ;;  %p718_p1 = scmp.lt.s32.totalorder %s1044_s4, %s716_s23 }
  0x83   : > { %p714_p9 = pneg %p713_p5  ;;  %p719_p2 = scmp.lt.s32.totalorder %s717_s5, %s711_s15 }
  0x84   : > { %532 = vmatmul.mubr.msk.f32.vlgmr.msra.gmra.mrb[0].mxu0 %vm278_vm1, %v273_v8 }
  0x85   : > { %p720_p7 = por %p719_p2, %p718_p1 }
  0x87   : > { %p721_p4 = pnand %p720_p7, %p714_p9 }
 0x157   : > { %v348_v16 = vpop.f32.mrb[0].mxu0 }
 0x158   : > { %v357_v17 = vmul.f32 %v356_v14, %v348_v16  ;;  %v533_v18 = vpop.f32.mrb[1].mxu0 }
 0x15a   : > { %v362_v19 = vadd.f32 %v361_v15, %v357_v17 }
 0x15c   : > { %363 = vst.msk [vmem:[%s272_s20] sm:$0xff] %vm278_vm1, %v362_v19 }
 0x15d   : > { %724 = shalt.err (!%p721_p4)
}
 0x15e   : > { %s725_s0 = scalar_lea.hbm %s1042_s27, 128  ;;  %s729_s8 = scalar_lea.hbm %s1095_s3, 256 }
 0x15f   : > { %p726_p8 = scmp.ne.s32.totalorder %s1042_s27, %s725_s0  ;;  %p730_p10 = scmp.lt.u32.totalorder %s1042_s27, %s1095_s3 }
 0x160   : > { %p731_p13 = scmp.lt.u32.totalorder %s729_s8, %s725_s0  ;;  %p733_p12 = scmp.lt.u32.totalorder %s725_s0, %s1042_s27 }
 0x161   : > { %p727_p11 = pnand %p726_p8, %p1114_p0 }
 0x162   : > { %p732_p3 = por %p731_p13, %p730_p10 }
 0x163   : > { %p728_p6 = pneg %p727_p11 }
 0x164   : > { %p734_p5 = por %p733_p12, %p732_p3 }
 0x166   : > { %p735_p9 = pnand %p734_p5, %p728_p6 }
 0x168   : > { %738 = shalt.err (!%p735_p9)
}
 0x169   : > { %548 = dma.vmem_to_hbm [thread:$0]  (%p1114_p0), %s1044_s4, 128, %s1042_s27, %s365_s10  }
 0x16a PF: > { %s392_s28 = sand.u32 1, %s781_s12   ;;  %p1115_p1 = scmp.ne.s32.totalorder %s1102_s21, 0 }
 0x16b   : > { %p1116_p2 = scmp.ge.s32.totalorder %s801_s17, 2  ;;  %s393_s30 = scalar_lea.sflag [#allocation4], %s392_s28 }
 0x16d   : > { %p562_p7 = pnand %p1116_p2, %p1115_p1 }
 0x16f   : > { %776 = dma.done.wait (!%p562_p7), %s393_s30, 128  }
 0x170   : > { %778 = vsyncadd (!%p562_p7), %s393_s30, 4294967168  ;;  %s22_s17 = sadd.s32 1, %s801_s17   ;;  %s1117_s12 = smov %s785_s13 }
 0x171   : > { %p19_p4 = scmp.ge.s32.totalorder %s22_s17, 4   ;;  %s1118_s13 = smov %s789_s14 }
 0x172   : > { %s1119_s14 = smov %s936_s29  ;;  %s1120_s15 = smov %s797_s16 }
 0x173   : > { %s1121_s16 = smov %s1123_s26  ;;  %21 = sbr.rel (!%p19_p4) target bundleno = 10 (0xa), region = 95 }
 0x17a   :  { %398 = vsyncpa [#allocation3], 1 }
 0x17b   :  { %400 = vsyncpa [#allocation3 + $0x1], 1 }
 0x17c   :  { %401 = vsyncpa [#allocation6], 1 }
 0x17d   :  { %403 = vsyncpa [#allocation6 + $0x1], 1 }
 0x17e   :  { %404 = vsyncpa [#allocation4], 1 }
 0x17f   :  { %406 = vsyncpa [#allocation4 + $0x1], 1 }

// kernel: tpu_custom_call.1
= control target key start
LH: loop header
LB: loop body
LE: loop exit
PB: predicated region body
PF: predicated region fallthrough
CT: control target
= control target key end

     0   :  { %s1092_s0 = inlined_call_operand.hbm [shape: f32[2,2,32], index: 0, kind: input, shape index: {}]   ;;  %s1093_s1 = inlined_call_operand.hbm [shape: f32[2,8,32], index: 1, kind: input, shape index: {}]   ;;  %s1094_s2 = inlined_call_operand.hbm [shape: f32[32,32], index: 2, kind: input, shape index: {}]   ;;  %s1095_s3 = inlined_call_operand.hbm [shape: f32[2,8,32], index: 3, kind: output, shape index: {}]  }
   0x1   :  { %1100 = sst [smem:[#allocation13_spill]] %s1092_s0 }
   0x2   :  { %8 = vsyncpa [#allocation3], 0 }
   0x3   :  { %10 = vsyncpa [#allocation3 + $0x1], 0 }
   0x4   :  { %11 = vsyncpa [#allocation6], 0 }
   0x5   :  { %13 = vsyncpa [#allocation6 + $0x1], 0 }
   0x6   :  { %14 = vsyncpa [#allocation4], 0 }
   0x7   :  { %16 = vsyncpa [#allocation4 + $0x1], 0  ;;  %s832_s12 = smov 0   ;;  %s834_s13 = smov 0  }
   0x8   :  { %s836_s14 = smov 0   ;;  %s838_s15 = smov 0  }
   0x9   :  { %s840_s16 = smov 0   ;;  %s842_s17 = smov 0  }
   0xa LB: > { %s863_s18 = sadd.s32 4294967295, %s801_s17   ;;  %s500_s19 = sadd.s32 4294967294, %s801_s17   ;;  %s801_s17 = sphi %s842_s17, %s22_s17   ;;  %s797_s16 = sphi %s840_s16, %s1121_s16   ;;  %s793_s15 = sphi %s838_s15, %s1120_s15   ;;  %s789_s14 = sphi %s836_s14, %s1119_s14   ;;  %s785_s13 = sphi %s834_s13, %s1118_s13   ;;  %s781_s12 = sphi %s832_s12, %s1117_s12  }
   0xb   : > { %p63_p0 = scmp.ne.s32.totalorder %s785_s13, %s781_s12  ;;  %p1096_p1 = scmp.eq.s32.totalorder %s863_s18, 0 }
   0xc   : > { %p151_p3 = scmp.eq.s32.totalorder %s500_s19, 1  ;;  %p501_p5 = scmp.ge.s32.totalorder %s801_s17, 1 }
   0xd   : > { %p872_p4 = por %p1096_p1, %p63_p0  ;;  %p158_p7 = scmp.lt.s32.totalorder %s801_s17, 3 }
   0xe   : > { %p877_p6 = por %p151_p3, %p63_p0  ;;  %s803_s23 = smov [#allocation7]  }
   0xf   : > { %s1101_s20 = scalar_select %p872_p4, 1, 0 }
  0x10   : > { %s1102_s21 = scalar_select %p877_p6, 1, 0 }
  0x11   : > { %p882_p8 = pnand %p501_p5, %p158_p7  ;;  %s172_s24 = sshll.u32 %s803_s23, 4  ;;  %s173_s24 = int_to_ptr.vmem [resolvable:$true] %s172_s24 }
  0x12   : > { %s41_s26 = sadd.s32 1, %s797_s16  ;;  %s623_s29 = scalar_lea.hbm %s1094_s2, 512 }
  0x13   : > { %s1103_s22 = scalar_select %p882_p8, 1, 0 }
  0x14   : > { %p550_p9 = pneg %p882_p8  ;;  %p624_p12 = scmp.ne.s32.totalorder %s1094_s2, %s623_s29 }
  0x15   : > { %p630_p5 = scmp.lt.u32.totalorder %s623_s29, %s1094_s2 }
  0x16   : > { %p891_p11 = pnand %p550_p9, %p1096_p1 }
  0x18   : > { %p625_p13 = pneg %p891_p11 }
  0x1a   : > { %p626_p0 = pnand %p625_p13, %p624_p12 }
  0x1c   : > { %p627_p3 = pneg %p626_p0 }
  0x1e   : > { %p632_p7 = pnand %p630_p5, %p627_p3 }
  0x20   : > { %635 = shalt.err (!%p632_p7)
}
  0x21   : > { %s636_s7 = scalar_lea.vmem %s173_s24, 512  ;;  %p644_p2 = scmp.lt.s32.totalorder %s173_s24, %s173_s24 }
  0x22   : > { %p637_p9 = scmp.ne.s32.totalorder %s173_s24, %s636_s7  ;;  %p645_p6 = scmp.lt.s32.totalorder %s636_s7, %s636_s7 }
  0x24   : > { %p639_p10 = pnand %p637_p9, %p625_p13  ;;  %p646_p4 = por %p645_p6, %p644_p2 }
  0x26   : > { %p640_p1 = pneg %p639_p10 }
  0x28   : > { %p647_p8 = pnand %p646_p4, %p640_p1 }
  0x2a   : > { %650 = shalt.err (!%p647_p8)
}
  0x2b   : > { %s804_s8 = smov 128   ;;  %s805_s9 = smov 8  }
  0x2c   : > { %553 = dma.hbm_to_vmem [thread:$0]  (!%p891_p11), %s1094_s2, 512, %s173_s24, [#allocation6], %s804_s8, %s804_s8, %s805_s9  }
  0x2d   : > { %p43_p1 = scmp.ge.s32.totalorder %s41_s26, 2  ;;  %s50_s19 = sadd.s32 1, %s789_s14 }
  0x2e   : > { %p57_p2 = scmp.ne.s32.totalorder %s789_s14, %s785_s13  ;;  %p58_p4 = scmp.eq.s32.totalorder %s801_s17, 0 }
  0x2f   : > { %s1123_s26 = smov (%p43_p1, %s41_s26), 0  ;;  %p1106_p8 = scmp.eq.s32.totalorder %s863_s18, 1 }
  0x30   : > { %p918_p6 = por %p58_p4, %p57_p2  ;;  %s45_s27 = ssub.s32 %s797_s16, %s1123_s26 }
  0x31   : > { %p924_p10 = por %p1106_p8, %p57_p2  ;;  %p566_p11 = scmp.lt.s32.totalorder %s801_s17, 2 }
  0x32   : > { %p48_p12 = scmp.eq.s32.totalorder %s45_s27, 0  ;;  %s932_s24 = sand.u32 1, %s789_s14  }
  0x33   : > { %s1107_s25 = scalar_select %p924_p10, 1, 0 }
  0x34   : > { %s504_s28 = sshll.u32 %s932_s24, 1  ;;  %s505_s30 = sshll.u32 %s797_s16, 5 }
  0x35   : > { %s936_s29 = scalar_select %p48_p12, %s789_s14, %s50_s19  }
  0x36   : > { %s1108_s0 = sld [smem:[#allocation13_spill]]  ;;  %s190_s7 = scalar_lea.vmem [#allocation2], %s504_s28 }
  0x37   : > { %s198_s8 = sshll.u32 %s190_s7, 4  ;;  %p948_p13 = pnand %p566_p11, %p918_p6  ;;  %s944_s8 = int_to_ptr.vmem [resolvable:$true] %s198_s8 }
  0x38   : > { %s205_s10 = sand.u32 1, %s801_s17   ;;  %s506_s11 = sshll.u32 %s932_s24, 3 }
  0x39   : > { %s187_s19 = scalar_lea.sflag [#allocation3], %s932_s24  ;;  %p653_p3 = pneg %p948_p13 }
  0x3c   : > { %s942_s6 = scalar_lea.hbm %s1108_s0, %s505_s30  ;;  %s656_s23 = scalar_lea.hbm %s1108_s0, 64 }
  0x3d   : > { %s651_s27 = scalar_lea.hbm %s942_s6, 32  ;;  %p657_p9 = scmp.lt.u32.totalorder %s942_s6, %s1108_s0 }
  0x3e   : > { %p652_p0 = scmp.ne.s32.totalorder %s942_s6, %s651_s27  ;;  %p658_p1 = scmp.lt.u32.totalorder %s656_s23, %s651_s27 }
  0x3f   : > { %p660_p4 = scmp.lt.u32.totalorder %s651_s27, %s942_s6 }
  0x40   : > { %p654_p5 = pnand %p653_p3, %p652_p0  ;;  %p659_p2 = por %p658_p1, %p657_p9 }
  0x42   : > { %p655_p7 = pneg %p654_p5  ;;  %p661_p6 = por %p660_p4, %p659_p2 }
  0x44   : > { %p662_p8 = pnand %p661_p6, %p655_p7 }
  0x46   : > { %665 = shalt.err (!%p662_p8)
}
  0x47   : > { %s666_s7 = scalar_lea.vmem %s944_s8, 32  ;;  %s806_s28 = smov [#allocation2]  }
  0x48   : > { %p667_p11 = scmp.ne.s32.totalorder %s944_s8, %s666_s7  ;;  %s671_s30 = sshll.u32 %s806_s28, 4  ;;  %s672_s30 = int_to_ptr.vmem [resolvable:$false] %s671_s30 }
  0x49   : > { %s673_s4 = scalar_lea.vmem %s672_s30, 64  ;;  %p674_p5 = scmp.lt.s32.totalorder %s944_s8, %s672_s30 }
  0x4a   : > { %p669_p12 = pnand %p667_p11, %p653_p3  ;;  %p675_p9 = scmp.lt.s32.totalorder %s673_s4, %s666_s7 }
  0x4c   : > { %p670_p0 = pneg %p669_p12  ;;  %p676_p1 = por %p675_p9, %p674_p5 }
  0x4e   : > { %p677_p2 = pnand %p676_p1, %p670_p0 }
  0x50   : > { %680 = shalt.err (!%p677_p2)
}
  0x51   : > { %557 = dma.hbm_to_vmem [thread:$0]  (!%p948_p13), %s942_s6, 32, %s944_s8, %s187_s19  }
  0x52   : > { %s507_s27 = sshll.u32 %s797_s16, 7  ;;  %s209_s7 = scalar_lea.vmem [#allocation5], %s506_s11 }
  0x53   : > { %s984_s28 = scalar_lea.hbm %s1093_s1, %s507_s27  ;;  %s217_s30 = sshll.u32 %s209_s7, 4  ;;  %s218_s30 = int_to_ptr.vmem [resolvable:$true] %s217_s30 }
  0x54   : > { %s206_s4 = scalar_lea.sflag [#allocation6], %s205_s10  ;;  %s681_s0 = scalar_lea.hbm %s984_s28, 128 }
  0x55   : > { %p682_p7 = scmp.ne.s32.totalorder %s984_s28, %s681_s0  ;;  %s686_s19 = scalar_lea.hbm %s1093_s1, 256 }
  0x56   : > { %p687_p8 = scmp.lt.u32.totalorder %s984_s28, %s1093_s1  ;;  %p688_p11 = scmp.lt.u32.totalorder %s686_s19, %s681_s0 }
  0x57   : > { %p684_p4 = pnand %p682_p7, %p653_p3  ;;  %p690_p0 = scmp.lt.u32.totalorder %s681_s0, %s984_s28 }
  0x58   : > { %p689_p12 = por %p688_p11, %p687_p8 }
  0x59   : > { %p685_p6 = pneg %p684_p4 }
  0x5a   : > { %p691_p5 = por %p690_p0, %p689_p12 }
  0x5c   : > { %p692_p9 = pnand %p691_p5, %p685_p6 }
  0x5e   : > { %695 = shalt.err (!%p692_p9)
}
  0x5f   : > { %s696_s10 = scalar_lea.vmem %s218_s30, 128  ;;  %s807_s11 = smov [#allocation5]  }
  0x60   : > { %p697_p1 = scmp.ne.s32.totalorder %s218_s30, %s696_s10  ;;  %s701_s23 = sshll.u32 %s807_s11, 4  ;;  %s702_s23 = int_to_ptr.vmem [resolvable:$false] %s701_s23 }
  0x61   : > { %s703_s5 = scalar_lea.vmem %s702_s23, 256  ;;  %p704_p4 = scmp.lt.s32.totalorder %s218_s30, %s702_s23 }
  0x62   : > { %p699_p2 = pnand %p697_p1, %p653_p3  ;;  %p705_p10 = scmp.lt.s32.totalorder %s703_s5, %s696_s10 }
  0x64   : > { %p700_p7 = pneg %p699_p2  ;;  %p706_p8 = por %p705_p10, %p704_p4 }
  0x66   : > { %p707_p11 = pnand %p706_p8, %p700_p7 }
  0x68   : > { %710 = shalt.err (!%p707_p11)
}
  0x69   : > { %560 = dma.hbm_to_vmem [thread:$0]  (!%p948_p13), %s984_s28, 128, %s218_s30, %s206_s4  }
  0x6a   : > { %p1110_p6 = scmp.ne.s32.totalorder %s1103_s22, 0 }
  0x6b   : > { %s1012_s0 = sand.u32 (!%p1110_p6), 1, %s785_s13   ;;  %p1111_p10 = scmp.ne.s32.totalorder (!%p1110_p6), %s1101_s20, 0 }
  0x6c   : > { %226 = sbr.rel (%p1110_p6) target bundleno = 362 (0x16a), region = 32  ;;  %s509_s7 = sshll.u32 (!%p1110_p6), %s1012_s0, 1 }
  0x6d   : > { %s229_s6 = scalar_lea.sflag (!%p1110_p6), [#allocation3], %s1012_s0  ;;  %s1016_s8 = scalar_lea.vmem (!%p1110_p6), [#allocation2], %s509_s7 }
  0x73   : > { %764 = dma.done.wait (%p1111_p10), %s229_s6, 32  }
  0x74   : > { %766 = vsyncadd (%p1111_p10), %s229_s6, 4294967264  ;;  %s237_s22 = sand.u32 1, %s863_s18   ;;  %s510_s9 = sshll.u32 %s1012_s0, 3 }
  0x75   : > { %s238_s28 = scalar_lea.sflag [#allocation6], %s237_s22  ;;  %s241_s30 = scalar_lea.vmem [#allocation5], %s510_s9 }
  0x76   : > { %768 = dma.done.wait (%p1111_p10), %s238_s28, 128  }
  0x77   : > { %770 = vsyncadd (%p1111_p10), %s238_s28, 4294967168  ;;  %p1112_p13 = scmp.eq.s32.totalorder %s863_s18, 0 }
  0x79   : > { %772 = dma.done.wait (%p1112_p13), [#allocation6], 512   ;;  %p1113_p3 = pmov %p1112_p13 }
  0x7a   : > { %v808_v0 = vmov 0.0|0.0   ;;  %vm809_vm0 = vmmov 0   ;;  %v810_v1 = vmov 0.0   ;;  %v274_v2 = vld [vmem:[#allocation7] sm:$0xff]  ;;  %v275_v3 = vld [vmem:[#allocation7 + $0x8] sm:$0xff]  ;;  %v276_v4 = vld [vmem:[#allocation7 + $0x10] sm:$0xff]  ;;  %v353_v9 = vlaneseq }
  0x7b   : > { %774 = vsyncadd (%p1113_p3), [#allocation6], 4294966784  ;;  %534 = vmatprep.subr.bf16.mxu0 %v808_v0  ;;  %531 = vmatprep.mubr.msk.f32.mxu0 %vm809_vm0, %v810_v1  ;;  %v535_v5 = vpack.c.bf16 %v275_v3, %v274_v2  ;;  %v277_v6 = vld [vmem:[#allocation7 + $0x18] sm:$0xff]  ;;  %vm278_vm1 = vcmask 261120   ;;  %v352_v12 = vld [vmem:[%s1016_s8] sm:$0x3] }
  0x7c   : > { %v538_v7 = vpack.c.bf16 %v277_v6, %v276_v4  ;;  %v273_v8 = vld [vmem:[%s241_s30] sm:$0xff]  ;;  %v354_v10 = vshrl.u32 %v353_v9, 7  ;;  %s515_s18 = sshll.u32 %s793_s15, 7  ;;  %s272_s20 = scalar_lea.vmem [#allocation8], %s510_s9 }
  0x7d   : > { %536 = vmatpush3.bf16.msra.mxu0 %v535_v5  ;;  %s380_s4 = sshll.u32 %s272_s20, 4  ;;  %s1042_s27 = scalar_lea.hbm %s1095_s3, %s515_s18  ;;  %s1044_s4 = int_to_ptr.vmem [resolvable:$true] %s380_s4 }
  0x7e   : > { %537 = vmatprep.subr.bf16.mxu0 %v808_v0  ;;  %v355_v11 = vsub.s32 0, %v354_v10  ;;  %v360_v13 = vsub.s32 1, %v354_v10  ;;  %s365_s10 = scalar_lea.sflag [#allocation4], %s1012_s0  ;;  %s711_s15 = scalar_lea.vmem %s1044_s4, 128 }
  0x7f   : > { %p712_p12 = scmp.ne.s32.totalorder %s1044_s4, %s711_s15  ;;  %p1114_p0 = scmp.ne.s32.totalorder %s1107_s25, 0 }
  0x80   : > { %v356_v14 = vrot.slane %v352_v12, %v355_v11  ;;  %v361_v15 = vrot.slane %v352_v12, %v360_v13  ;;  %s811_s11 = smov [#allocation8]  }
  0x81   : > { %539 = vmatpush3.bf16.msra.mxu0 %v538_v7  ;;  %p713_p5 = pnand %p712_p12, %p1114_p0  ;;  %s715_s23 = sshll.u32 %s811_s11, 4  ;;  %s716_s23 = int_to_ptr.vmem [resolvable:$false] %s715_s23 }
  0x82   : > { %s717_s5 = scalar_lea.vmem %s716_s23, 256  ;;  %p718_p1 = scmp.lt.s32.totalorder %s1044_s4, %s716_s23 }
  0x83   : > { %p714_p9 = pneg %p713_p5  ;;  %p719_p2 = scmp.lt.s32.totalorder %s717_s5, %s711_s15 }
  0x84   : > { %532 = vmatmul.mubr.msk.f32.vlgmr.msra.gmra.mrb[0].mxu0 %vm278_vm1, %v273_v8 }
  0x85   : > { %p720_p7 = por %p719_p2, %p718_p1 }
  0x87   : > { %p721_p4 = pnand %p720_p7, %p714_p9 }
 0x157   : > { %v348_v16 = vpop.f32.mrb[0].mxu0 }
 0x158   : > { %v357_v17 = vmul.f32 %v356_v14, %v348_v16  ;;  %v533_v18 = vpop.f32.mrb[1].mxu0 }
 0x15a   : > { %v362_v19 = vadd.f32 %v361_v15, %v357_v17 }
 0x15c   : > { %363 = vst.msk [vmem:[%s272_s20] sm:$0xff] %vm278_vm1, %v362_v19 }
 0x15d   : > { %724 = shalt.err (!%p721_p4)
}
 0x15e   : > { %s725_s0 = scalar_lea.hbm %s1042_s27, 128  ;;  %s729_s8 = scalar_lea.hbm %s1095_s3, 256 }
 0x15f   : > { %p726_p8 = scmp.ne.s32.totalorder %s1042_s27, %s725_s0  ;;  %p730_p10 = scmp.lt.u32.totalorder %s1042_s27, %s1095_s3 }
 0x160   : > { %p731_p13 = scmp.lt.u32.totalorder %s729_s8, %s725_s0  ;;  %p733_p12 = scmp.lt.u32.totalorder %s725_s0, %s1042_s27 }
 0x161   : > { %p727_p11 = pnand %p726_p8, %p1114_p0 }
 0x162   : > { %p732_p3 = por %p731_p13, %p730_p10 }
 0x163   : > { %p728_p6 = pneg %p727_p11 }
 0x164   : > { %p734_p5 = por %p733_p12, %p732_p3 }
 0x166   : > { %p735_p9 = pnand %p734_p5, %p728_p6 }
 0x168   : > { %738 = shalt.err (!%p735_p9)
}
 0x169   : > { %548 = dma.vmem_to_hbm [thread:$0]  (%p1114_p0), %s1044_s4, 128, %s1042_s27, %s365_s10  }
 0x16a PF: > { %s392_s28 = sand.u32 1, %s781_s12   ;;  %p1115_p1 = scmp.ne.s32.totalorder %s1102_s21, 0 }
 0x16b   : > { %p1116_p2 = scmp.ge.s32.totalorder %s801_s17, 2  ;;  %s393_s30 = scalar_lea.sflag [#allocation4], %s392_s28 }
 0x16d   : > { %p562_p7 = pnand %p1116_p2, %p1115_p1 }
 0x16f   : > { %776 = dma.done.wait (!%p562_p7), %s393_s30, 128  }
 0x170   : > { %778 = vsyncadd (!%p562_p7), %s393_s30, 4294967168  ;;  %s22_s17 = sadd.s32 1, %s801_s17   ;;  %s1117_s12 = smov %s785_s13 }
 0x171   : > { %p19_p4 = scmp.ge.s32.totalorder %s22_s17, 4   ;;  %s1118_s13 = smov %s789_s14 }
 0x172   : > { %s1119_s14 = smov %s936_s29  ;;  %s1120_s15 = smov %s797_s16 }
 0x173   : > { %s1121_s16 = smov %s1123_s26  ;;  %21 = sbr.rel (!%p19_p4) target bundleno = 10 (0xa), region = 95 }
 0x17a   :  { %398 = vsyncpa [#allocation3], 1 }
 0x17b   :  { %400 = vsyncpa [#allocation3 + $0x1], 1 }
 0x17c   :  { %401 = vsyncpa [#allocation6], 1 }
 0x17d   :  { %403 = vsyncpa [#allocation6 + $0x1], 1 }
 0x17e   :  { %404 = vsyncpa [#allocation4], 1 }
 0x17f   :  { %406 = vsyncpa [#allocation4 + $0x1], 1 }

</bundles_post_ra>
